<compile_context>
chip_gen: v7x
topology: tpu7x:2x2x1
jax: 0.10.0
libtpu: 0.0.40
codegen_flags: <defaults>
</compile_context>

<pallas_src>
import functools

import jax
import jax.numpy as jnp
from jax.experimental import pallas as pl
from jax.experimental.pallas import tpu as pltpu


def _round_up(x, m):
    return ((x + m - 1) // m) * m


def _cde_mlp_kernel(z_ref, w0_ref, b0_ref, w1_ref, b1_ref, w2_ref, b2_ref, o_ref):
    # One batch tile per grid step; weights are VMEM-resident across steps.
    z = z_ref[...]  # (TB, hidden) f32

    # Layer 0: relu(z @ W0 + b0). Cast the activation to the weight dtype
    # (bf16 by default) so the MXU runs its full-rate path; accumulate in f32.
    h0 = jnp.dot(z.astype(w0_ref.dtype), w0_ref[...],
                 preferred_element_type=jnp.float32) + b0_ref[...]
    h0 = jnp.maximum(h0, 0.0)

    # Layer 1: relu(h0 @ W1 + b1)
    h1 = jnp.dot(h0.astype(w1_ref.dtype), w1_ref[...],
                 preferred_element_type=jnp.float32) + b1_ref[...]
    h1 = jnp.maximum(h1, 0.0)

    # Layer 2: tanh(h1 @ W2 + b2)   (tanh -> EUP, free slot next to the MXU)
    h2 = jnp.dot(h1.astype(w2_ref.dtype), w2_ref[...],
                 preferred_element_type=jnp.float32) + b2_ref[...]
    o_ref[...] = jnp.tanh(h2).astype(o_ref.dtype)


@functools.partial(jax.jit, static_argnums=(2, 3, 4))
def cde_func_forward(z, params, input_channels, hidden_channels, block_b=256):
    """z: (B, hidden_channels) f32 -> (B, hidden_channels, input_channels) f32."""
    w0, b0, w1, b1, w2, b2 = params
    B, H = z.shape
    width = w1.shape[1]
    out_dim = input_channels * hidden_channels

    # Batch tile: multiple of 8 sublanes, capped at block_b (default 256 to
    # fill the v6e/v7x 256-wide MXU; also fine on v5e's 128-wide MXU).
    bb = min(block_b, _round_up(B, 8))
    Bp = _round_up(B, bb)
    if Bp != B:
        z = jnp.pad(z, ((0, Bp - B), (0, 0)))
    grid = (Bp // bb,)

    resident = lambda shape: pl.BlockSpec(shape, lambda i: (0, 0))  # once per call

    cost = pl.CostEstimate(
        flops=2 * Bp * (H * H + H * width + width * out_dim),
        transcendentals=Bp * out_dim,  # tanh
        bytes_accessed=(z.size * z.dtype.itemsize
                        + sum(p.size * p.dtype.itemsize for p in params)
                        + Bp * out_dim * 4),
    )

    flat = pl.pallas_call(
        _cde_mlp_kernel,
        out_shape=jax.ShapeDtypeStruct((Bp, out_dim), jnp.float32),
        grid_spec=pltpu.PrefetchScalarGridSpec(
            num_scalar_prefetch=0,
            grid=grid,
            in_specs=[
                pl.BlockSpec((bb, H), lambda i: (i, 0)),   # z: tiled over batch
                resident(w0.shape), resident(b0.shape),    # weights stay in VMEM
                resident(w1.shape), resident(b1.shape),
                resident(w2.shape), resident(b2.shape),
            ],
            out_specs=pl.BlockSpec((bb, out_dim), lambda i: (i, 0)),
        ),
        compiler_params=pltpu.CompilerParams(
            dimension_semantics=("parallel",),  # batch tiles split across TCs (v7x)
        ),
        cost_estimate=cost,
    )(z, w0, b0, w1, b1, w2, b2)

    flat = flat[:B]
    # torch: z.view(B, hidden_channels, input_channels) -- row-major reshape.
    return flat.reshape(B, hidden_channels, input_channels)


def init_params(key, input_channels, hidden_channels, width):
    """nn.Linear-style init (uniform +/- 1/sqrt(fan_in)); weights already
    transposed to (in, out); biases (1, out); all float32."""
    def linear(k, fan_in, fan_out):
        kw, kb = jax.random.split(k)
        bound = 1.0 / jnp.sqrt(fan_in)
        w = jax.random.uniform(kw, (fan_in, fan_out), jnp.float32, -bound, bound)
        b = jax.random.uniform(kb, (1, fan_out), jnp.float32, -bound, bound)
        return w, b

    k0, k1, k2 = jax.random.split(key, 3)
    w0, b0 = linear(k0, hidden_channels, hidden_channels)
    w1, b1 = linear(k1, hidden_channels, width)
    w2, b2 = linear(k2, width, input_channels * hidden_channels)
    return (w0, b0, w1, b1, w2, b2)


def cast_weights(params, dtype):
    """Store weight matrices in a low-precision MXU dtype; keep biases f32."""
    w0, b0, w1, b1, w2, b2 = params
    return (w0.astype(dtype), b0, w1.astype(dtype), b1, w2.astype(dtype), b2)


def reference_forward(z, params, input_channels, hidden_channels):
    """Pure-f32 reference matching the PyTorch module."""
    w0, b0, w1, b1, w2, b2 = params
    h = jnp.maximum(z @ w0 + b0, 0.0)
    h = jnp.maximum(h @ w1 + b1, 0.0)
    h = jnp.tanh(h @ w2 + b2)
    return h.reshape(z.shape[0], hidden_channels, input_channels)


if __name__ == "__main__":
    input_channels = 4
    hidden_channels = 32
    width = 128

    key = jax.random.PRNGKey(0)
    kp, kz, kz2 = jax.random.split(key, 3)
    params_f32 = init_params(kp, input_channels, hidden_channels, width)
    params = cast_weights(params_f32, jnp.bfloat16)  # bf16 MXU path, f32 accumulate

    # Small case (single batch tile).
    batch = 8
    z = jax.random.normal(kz, (batch, hidden_channels), jnp.float32)
    out = jax.block_until_ready(
        cde_func_forward(z, params, input_channels, hidden_channels))
    ref = reference_forward(z, params_f32, input_channels, hidden_channels)
    assert out.shape == (batch, hidden_channels, input_channels), out.shape
    # bf16 weights on the MXU vs pure-f32 reference: loose-but-tight-enough tol.
    assert jnp.allclose(out, ref, atol=2e-2, rtol=2e-2), float(jnp.max(jnp.abs(out - ref)))

    # Larger case exercising the batch grid (padding + multiple parallel tiles).
    batch2 = 300
    z2 = jax.random.normal(kz2, (batch2, hidden_channels), jnp.float32)
    out2 = jax.block_until_ready(
        cde_func_forward(z2, params, input_channels, hidden_channels, 256))
    ref2 = reference_forward(z2, params_f32, input_channels, hidden_channels)
    assert out2.shape == (batch2, hidden_channels, input_channels), out2.shape
    assert jnp.allclose(out2, ref2, atol=2e-2, rtol=2e-2), float(jnp.max(jnp.abs(out2 - ref2)))

    print("KERNEL_OK")
</pallas_src>

<mosaic_0001>
module attributes {stable_mosaic.version = 11 : i64} {
  func.func @_cde_mlp_kernel(%arg0: i32, %arg1: memref<8x32xf32, #tpu.memory_space<vmem>>, %arg2: memref<32x32xbf16, #tpu.memory_space<vmem>>, %arg3: memref<1x32xf32, #tpu.memory_space<vmem>>, %arg4: memref<32x128xbf16, #tpu.memory_space<vmem>>, %arg5: memref<1x128xf32, #tpu.memory_space<vmem>>, %arg6: memref<128x128xbf16, #tpu.memory_space<vmem>>, %arg7: memref<1x128xf32, #tpu.memory_space<vmem>>, %arg8: memref<8x128xf32, #tpu.memory_space<vmem>>) attributes {dimension_semantics = [#tpu.dimension_semantics<parallel>], iteration_bounds = array<i64: 1>, scalar_prefetch = 0 : i64, scratch_operands = 0 : i64, tpu.core_type = #tpu.core_type<tc>, window_params = [{transform_indices = @transform_0, window_bounds = array<i64: 8, 32>}, {pipeline_mode = #tpu.pipeline_mode<synchronous>, transform_indices = @transform_1, window_bounds = array<i64: 32, 32>}, {pipeline_mode = #tpu.pipeline_mode<synchronous>, transform_indices = @transform_2, window_bounds = array<i64: 1, 32>}, {pipeline_mode = #tpu.pipeline_mode<synchronous>, transform_indices = @transform_3, window_bounds = array<i64: 32, 128>}, {pipeline_mode = #tpu.pipeline_mode<synchronous>, transform_indices = @transform_4, window_bounds = array<i64: 1, 128>}, {pipeline_mode = #tpu.pipeline_mode<synchronous>, transform_indices = @transform_5, window_bounds = array<i64: 128, 128>}, {pipeline_mode = #tpu.pipeline_mode<synchronous>, transform_indices = @transform_6, window_bounds = array<i64: 1, 128>}, {transform_indices = @transform_7, window_bounds = array<i64: 8, 128>}]} {
    %c0 = arith.constant 0 : index
    %c0_0 = arith.constant 0 : index
    %0 = vector.load %arg1[%c0, %c0_0] : memref<8x32xf32, #tpu.memory_space<vmem>>, vector<8x32xf32>
    %1 = arith.truncf %0 : vector<8x32xf32> to vector<8x32xbf16>
    %c0_1 = arith.constant 0 : index
    %c0_2 = arith.constant 0 : index
    %2 = vector.load %arg2[%c0_1, %c0_2] : memref<32x32xbf16, #tpu.memory_space<vmem>>, vector<32x32xbf16>
    %cst = arith.constant dense<0.000000e+00> : vector<8x32xf32>
    %3 = tpu.matmul %1, %2, %cst {dimension_numbers = #tpu.dot_dimension_numbers<[1], [0], [0], [1], [0, 0, 1, 1], [], []>} : vector<8x32xbf16>, vector<32x32xbf16>, vector<8x32xf32> -> vector<8x32xf32>
    %c0_3 = arith.constant 0 : index
    %c0_4 = arith.constant 0 : index
    %4 = vector.load %arg3[%c0_3, %c0_4] : memref<1x32xf32, #tpu.memory_space<vmem>>, vector<1x32xf32>
    %5 = vector.broadcast %4 : vector<1x32xf32> to vector<8x32xf32>
    %6 = arith.addf %3, %5 : vector<8x32xf32>
    %cst_5 = arith.constant 0.000000e+00 : f32
    %7 = vector.broadcast %cst_5 : f32 to vector<8x32xf32>
    %8 = arith.maximumf %6, %7 : vector<8x32xf32>
    %9 = arith.truncf %8 : vector<8x32xf32> to vector<8x32xbf16>
    %c0_6 = arith.constant 0 : index
    %c0_7 = arith.constant 0 : index
    %10 = vector.load %arg4[%c0_6, %c0_7] : memref<32x128xbf16, #tpu.memory_space<vmem>>, vector<32x128xbf16>
    %cst_8 = arith.constant dense<0.000000e+00> : vector<8x128xf32>
    %11 = tpu.matmul %9, %10, %cst_8 {dimension_numbers = #tpu.dot_dimension_numbers<[1], [0], [0], [1], [0, 0, 1, 1], [], []>} : vector<8x32xbf16>, vector<32x128xbf16>, vector<8x128xf32> -> vector<8x128xf32>
    %c0_9 = arith.constant 0 : index
    %c0_10 = arith.constant 0 : index
    %12 = vector.load %arg5[%c0_9, %c0_10] : memref<1x128xf32, #tpu.memory_space<vmem>>, vector<1x128xf32>
    %13 = vector.broadcast %12 : vector<1x128xf32> to vector<8x128xf32>
    %14 = arith.addf %11, %13 : vector<8x128xf32>
    %cst_11 = arith.constant 0.000000e+00 : f32
    %15 = vector.broadcast %cst_11 : f32 to vector<8x128xf32>
    %16 = arith.maximumf %14, %15 : vector<8x128xf32>
    %17 = arith.truncf %16 : vector<8x128xf32> to vector<8x128xbf16>
    %c0_12 = arith.constant 0 : index
    %c0_13 = arith.constant 0 : index
    %18 = vector.load %arg6[%c0_12, %c0_13] : memref<128x128xbf16, #tpu.memory_space<vmem>>, vector<128x128xbf16>
    %cst_14 = arith.constant dense<0.000000e+00> : vector<8x128xf32>
    %19 = tpu.matmul %17, %18, %cst_14 {dimension_numbers = #tpu.dot_dimension_numbers<[1], [0], [0], [1], [0, 0, 1, 1], [], []>} : vector<8x128xbf16>, vector<128x128xbf16>, vector<8x128xf32> -> vector<8x128xf32>
    %c0_15 = arith.constant 0 : index
    %c0_16 = arith.constant 0 : index
    %20 = vector.load %arg7[%c0_15, %c0_16] : memref<1x128xf32, #tpu.memory_space<vmem>>, vector<1x128xf32>
    %21 = vector.broadcast %20 : vector<1x128xf32> to vector<8x128xf32>
    %22 = arith.addf %19, %21 : vector<8x128xf32>
    %23 = math.tanh %22 : vector<8x128xf32>
    %c0_17 = arith.constant 0 : index
    %c0_18 = arith.constant 0 : index
    %24 = vector.load %arg8[%c0_17, %c0_18] : memref<8x128xf32, #tpu.memory_space<vmem>>, vector<8x128xf32>
    tpu.vector_store %arg8[%c0_17, %c0_18], %23 {strides = array<i32>} : memref<8x128xf32, #tpu.memory_space<vmem>>, vector<8x128xf32>,
    return
  }
  func.func @transform_0(%arg0: i32) -> (i32, i32) {
    %c0_i32 = arith.constant 0 : i32
    %c0_i32_0 = arith.constant 0 : i32
    return %arg0, %c0_i32 : i32, i32
  }
  func.func @transform_1(%arg0: i32) -> (i32, i32) {
    %c0_i32 = arith.constant 0 : i32
    %c0_i32_0 = arith.constant 0 : i32
    %c0_i32_1 = arith.constant 0 : i32
    return %c0_i32, %c0_i32_0 : i32, i32
  }
  func.func @transform_2(%arg0: i32) -> (i32, i32) {
    %c0_i32 = arith.constant 0 : i32
    %c0_i32_0 = arith.constant 0 : i32
    %c0_i32_1 = arith.constant 0 : i32
    return %c0_i32, %c0_i32_0 : i32, i32
  }
  func.func @transform_3(%arg0: i32) -> (i32, i32) {
    %c0_i32 = arith.constant 0 : i32
    %c0_i32_0 = arith.constant 0 : i32
    %c0_i32_1 = arith.constant 0 : i32
    return %c0_i32, %c0_i32_0 : i32, i32
  }
  func.func @transform_4(%arg0: i32) -> (i32, i32) {
    %c0_i32 = arith.constant 0 : i32
    %c0_i32_0 = arith.constant 0 : i32
    %c0_i32_1 = arith.constant 0 : i32
    return %c0_i32, %c0_i32_0 : i32, i32
  }
  func.func @transform_5(%arg0: i32) -> (i32, i32) {
    %c0_i32 = arith.constant 0 : i32
    %c0_i32_0 = arith.constant 0 : i32
    %c0_i32_1 = arith.constant 0 : i32
    return %c0_i32, %c0_i32_0 : i32, i32
  }
  func.func @transform_6(%arg0: i32) -> (i32, i32) {
    %c0_i32 = arith.constant 0 : i32
    %c0_i32_0 = arith.constant 0 : i32
    %c0_i32_1 = arith.constant 0 : i32
    return %c0_i32, %c0_i32_0 : i32, i32
  }
  func.func @transform_7(%arg0: i32) -> (i32, i32) {
    %c0_i32 = arith.constant 0 : i32
    %c0_i32_0 = arith.constant 0 : i32
    return %arg0, %c0_i32 : i32, i32
  }
}

</mosaic_0001>

<bundles_post_ra>
// kernel: cde_func_forward.1
= control target key start
LH: loop header
LB: loop body
LE: loop exit
PB: predicated region body
PF: predicated region fallthrough
CT: control target
= control target key end

     0   :  { %12 = vsyncpa [#allocation3], 0  ;;  %s645_s0 = inlined_call_operand.hbm [shape: f32[8,32], index: 0, kind: input, shape index: {}]   ;;  %s646_s1 = inlined_call_operand.hbm [shape: bf16[32,32], index: 1, kind: input, shape index: {}]   ;;  %s647_s2 = inlined_call_operand.vmem [shape: f32[1,32], index: 2, kind: input, shape index: {}]   ;;  %s648_s3 = inlined_call_operand.hbm [shape: bf16[32,128], index: 3, kind: input, shape index: {}]   ;;  %s649_s4 = inlined_call_operand.vmem [shape: f32[1,128], index: 4, kind: input, shape index: {}]   ;;  %s650_s5 = inlined_call_operand.hbm [shape: bf16[128,128], index: 5, kind: input, shape index: {}]   ;;  %s651_s6 = inlined_call_operand.vmem [shape: f32[1,128], index: 6, kind: input, shape index: {}]   ;;  %s652_s7 = inlined_call_operand.vmem [shape: f32[8,128], index: 7, kind: output, shape index: {}]  }
   0x1   :  { %13 = vsyncpa [#allocation5], 0 }
   0x2   :  { %14 = vsyncpa [#allocation8], 0  ;;  %s523_s24 = smov [#allocation4]   ;;  %s429_s28 = scalar_lea.hbm %s646_s1, 256 }
   0x3   :  { %s30_s25 = sshll.u32 %s523_s24, 4  ;;  %p430_p0 = scmp.ne.s32.totalorder %s646_s1, %s429_s28  ;;  %s31_s25 = int_to_ptr.vmem [resolvable:$true] %s30_s25 }
   0x4   :  { %p433_p1 = scmp.lt.u32.totalorder %s429_s28, %s646_s1 }
   0x6   :  { %p435_p2 = pnand %p433_p1, %p430_p0 }
   0x8   :  { %438 = shalt.err (!%p435_p2)
}
   0x9   :  { %s439_s10 = scalar_lea.vmem %s31_s25, 256  ;;  %p444_p4 = scmp.lt.s32.totalorder %s31_s25, %s31_s25 }
   0xa   :  { %p440_p3 = scmp.ne.s32.totalorder %s31_s25, %s439_s10  ;;  %p445_p5 = scmp.lt.s32.totalorder %s439_s10, %s439_s10 }
   0xc   :  { %p446_p6 = por %p445_p5, %p444_p4 }
   0xe   :  { %p447_p7 = pnand %p446_p6, %p440_p3 }
  0x10   :  { %450 = shalt.err (!%p447_p7)
}
  0x11   :  { %s524_s11 = smov 64   ;;  %s525_s12 = smov 4  }
  0x12   :  { %36 = dma.hbm_to_vmem [thread:$0]  %s646_s1, 256, %s31_s25, [#allocation5], %s524_s11, %s524_s11, %s525_s12  }
  0x13   :  { %s526_s15 = smov [#allocation2]   ;;  %s527_s17 = smov [#allocation6]  }
  0x14   :  { %s21_s16 = sshll.u32 %s526_s15, 4  ;;  %s44_s18 = sshll.u32 %s527_s17, 4  ;;  %s22_s16 = int_to_ptr.vmem [resolvable:$true] %s21_s16  ;;  %s45_s18 = int_to_ptr.vmem [resolvable:$true] %s44_s18 }
  0x15   :  { %s451_s21 = scalar_lea.hbm %s645_s0, 128 }
  0x16   :  { %p452_p8 = scmp.ne.s32.totalorder %s645_s0, %s451_s21  ;;  %p455_p9 = scmp.lt.u32.totalorder %s451_s21, %s645_s0 }
  0x18   :  { %p457_p10 = pnand %p455_p9, %p452_p8 }
  0x1a   :  { %460 = shalt.err (!%p457_p10)
}
  0x1b   :  { %s461_s1 = scalar_lea.vmem %s22_s16, 128  ;;  %p466_p12 = scmp.lt.s32.totalorder %s22_s16, %s22_s16 }
  0x1c   :  { %p462_p11 = scmp.ne.s32.totalorder %s22_s16, %s461_s1  ;;  %p467_p13 = scmp.lt.s32.totalorder %s461_s1, %s461_s1 }
  0x1e   :  { %p468_p0 = por %p467_p13, %p466_p12 }
  0x20   :  { %p469_p1 = pnand %p468_p0, %p462_p11 }
  0x22   :  { %472 = shalt.err (!%p469_p1)
}
  0x23   :  { %24 = dma.hbm_to_vmem [thread:$0]  %s645_s0, 128, %s22_s16, [#allocation3]  }
  0x24   :  { %s473_s30 = scalar_lea.hbm %s648_s3, 256 }
  0x25   :  { %p474_p2 = scmp.ne.s32.totalorder %s648_s3, %s473_s30  ;;  %p477_p3 = scmp.lt.u32.totalorder %s473_s30, %s648_s3 }
  0x27   :  { %p479_p4 = pnand %p477_p3, %p474_p2 }
  0x29   :  { %482 = shalt.err (!%p479_p4)
}
  0x2a   :  { %s483_s14 = scalar_lea.vmem %s45_s18, 256  ;;  %p488_p6 = scmp.lt.s32.totalorder %s45_s18, %s45_s18 }
  0x2b   :  { %p484_p5 = scmp.ne.s32.totalorder %s45_s18, %s483_s14  ;;  %p489_p7 = scmp.lt.s32.totalorder %s483_s14, %s483_s14 }
  0x2d   :  { %p490_p8 = por %p489_p7, %p488_p6 }
  0x2f   :  { %p491_p9 = pnand %p490_p8, %p484_p5 }
  0x31   :  { %494 = shalt.err (!%p491_p9)
}
  0x32   :  { %50 = dma.hbm_to_vmem [thread:$0]  %s648_s3, 256, %s45_s18, [#allocation5], %s524_s11, %s524_s11, %s525_s12  }
  0x33   :  { %s528_s16 = smov [#allocation7]   ;;  %s495_s21 = scalar_lea.hbm %s650_s5, 1024 }
  0x34   :  { %s58_s17 = sshll.u32 %s528_s16, 4  ;;  %p496_p10 = scmp.ne.s32.totalorder %s650_s5, %s495_s21  ;;  %s59_s17 = int_to_ptr.vmem [resolvable:$true] %s58_s17 }
  0x35   :  { %p499_p11 = scmp.lt.u32.totalorder %s495_s21, %s650_s5 }
  0x37   :  { %p501_p12 = pnand %p499_p11, %p496_p10 }
  0x39   :  { %504 = shalt.err (!%p501_p12)
}
  0x3a   :  { %s505_s1 = scalar_lea.vmem %s59_s17, 1024  ;;  %p510_p0 = scmp.lt.s32.totalorder %s59_s17, %s59_s17 }
  0x3b   :  { %p506_p13 = scmp.ne.s32.totalorder %s59_s17, %s505_s1  ;;  %p511_p1 = scmp.lt.s32.totalorder %s505_s1, %s505_s1 }
  0x3d   :  { %p512_p2 = por %p511_p1, %p510_p0 }
  0x3f   :  { %p513_p3 = pnand %p512_p2, %p506_p13 }
  0x41   :  { %516 = shalt.err (!%p513_p3)
}
  0x42   :  { %64 = dma.hbm_to_vmem [thread:$0]  %s650_s5, 1024, %s59_s17, [#allocation8], %s524_s11, %s524_s11, %s525_s12  }
  0x43   :  { %517 = dma.done.wait [#allocation3], 128  }
  0x44   :  { %518 = vsyncadd [#allocation3], 4294967168 }
  0x45   :  { %519 = dma.done.wait [#allocation5], 512  }
  0x46   :  { %520 = vsyncadd [#allocation5], 4294966784 }
  0x47   :  { %521 = dma.done.wait [#allocation8], 1024  }
  0x48   :  { %522 = vsyncadd [#allocation8], 4294966272  ;;  %v529_v0 = vmov 0.0   ;;  %vm530_vm0 = vmmov 0   ;;  %v415_v1 = vld [vmem:[#allocation4] sm:$0xff]   ;;  %v416_v2 = vld [vmem:[#allocation4 + $0x8] sm:$0xff]  }
  0x49   :  { %371 = vmatprep.subr.bf16.mxu1 %v529_v0  ;;  %375 = vmatprep.mubr.msk.bf16.mxu1 %vm530_vm0, %v529_v0  ;;  %v80_v3 = vld [vmem:[#allocation2] sm:$0xff]  ;;  %vm105_vm1 = vcmask 261120   ;;  %v417_v4 = vld [vmem:[#allocation6] sm:$0xff]   ;;  %v419_v7 = vld [vmem:[#allocation7] sm:$0xff]  }
  0x4a   :  { %387 = vmatprep.subr.bf16.mxu0 %v529_v0  ;;  %403 = vmatprep.mubr.msk.bf16.mxu0 %vm530_vm0, %v529_v0  ;;  %v81_v5 = vpack.c.bf16 %v80_v3, %v80_v3  ;;  %v418_v6 = vld [vmem:[#allocation6 + $0x8] sm:$0xff]   ;;  %v420_v8 = vld [vmem:[#allocation7 + $0x8] sm:$0xff]   ;;  %v421_v9 = vld [vmem:[#allocation7 + $0x10] sm:$0xff]  }
  0x4b   :  { %372 = vmatpush3.bf16.msra.mxu1 %v415_v1  ;;  %388 = vmatpush3.bf16.msra.mxu0 %v419_v7  ;;  %v422_v10 = vld [vmem:[#allocation7 + $0x18] sm:$0xff]   ;;  %v423_v11 = vld [vmem:[#allocation7 + $0x20] sm:$0xff]   ;;  %v424_v12 = vld [vmem:[#allocation7 + $0x28] sm:$0xff]  }
  0x4c   :  { %373 = vmatprep.subr.bf16.mxu1 %v529_v0  ;;  %389 = vmatprep.subr.bf16.mxu0 %v529_v0  ;;  %v339_v13 = vld [vmem:[%s647_s2] ss:$0 sm:$0xff]  ;;  %v425_v21 = vld [vmem:[#allocation7 + $0x30] sm:$0xff]  }
  0x4d   :  { %v426_v22 = vld [vmem:[#allocation7 + $0x38] sm:$0xff]  }
  0x4e   :  { %v343_v23 = vld [vmem:[%s649_s4] ss:$0 sm:$0xff] }
  0x4f   :  { %374 = vmatpush3.bf16.msra.mxu1 %v416_v2  ;;  %390 = vmatpush3.bf16.msra.mxu0 %v420_v8  ;;  %v347_v31 = vld [vmem:[%s651_s6] ss:$0 sm:$0xff] }
  0x50   :  { %379 = vmatprep.subr.bf16.mxu1 %v529_v0  ;;  %391 = vmatprep.subr.bf16.mxu0 %v529_v0 }
  0x52   :  { %376 = vmatmul.mubr.msk.bf16.vlgmr.msra.gmra.mrb[0].mxu1 %vm105_vm1, %v81_v5 }
  0x53   :  { %380 = vmatpush3.bf16.msra.mxu1 %v417_v4  ;;  %383 = vmatprep.mubr.msk.bf16.mxu1 %vm530_vm0, %v529_v0 }
  0x54   :  { %381 = vmatprep.subr.bf16.mxu1 %v529_v0  ;;  %392 = vmatpush3.bf16.msra.mxu0 %v421_v9 }
  0x55   :  { %393 = vmatprep.subr.bf16.mxu0 %v529_v0 }
  0x57   :  { %382 = vmatpush3.bf16.msra.mxu1 %v418_v6 }
  0x58   :  { %394 = vmatpush3.bf16.msra.mxu0 %v422_v10 }
  0x59   :  { %395 = vmatprep.subr.bf16.mxu0 %v529_v0 }
  0x5c   :  { %396 = vmatpush3.bf16.msra.mxu0 %v423_v11 }
  0x5d   :  { %397 = vmatprep.subr.bf16.mxu0 %v529_v0 }
  0x60   :  { %398 = vmatpush3.bf16.msra.mxu0 %v424_v12 }
  0x61   :  { %399 = vmatprep.subr.bf16.mxu0 %v529_v0 }
  0x64   :  { %400 = vmatpush3.bf16.msra.mxu0 %v425_v21 }
  0x65   :  { %401 = vmatprep.subr.bf16.mxu0 %v529_v0 }
  0x68   :  { %402 = vmatpush3.bf16.msra.mxu0 %v426_v22 }
 0x125   :  { %v143_v14 = vpop.f32.mrb[0].mxu1 }
 0x126   :  { %v144_v15 = vadd.f32 %v339_v13, %v143_v14  ;;  %v377_v16 = vpop.f32.mrb[1].mxu1 }
 0x127   :  { %v146_v17 = vpop.f32.mrb[2].mxu1 }
 0x128   :  { %v149_v18 = vmax.f32 %v144_v15, 0.0  ;;  %v378_v19 = vpop.f32.mrb[3].mxu1 }
 0x12a   :  { %v150_v20 = vpack.c.bf16 %v149_v18, %v149_v18 }
 0x12c   :  { %384 = vmatmul.mubr.msk.bf16.vlgmr.msra.gmra.mrb[4].mxu1 %vm105_vm1, %v150_v20 }
 0x1ff   :  { %v211_v24 = vpop.f32.mrb[4].mxu1 }
 0x200   :  { %v212_v25 = vadd.f32 %v343_v23, %v211_v24  ;;  %v385_v26 = vpop.f32.mrb[5].mxu1 }
 0x201   :  { %v214_v27 = vpop.f32.mrb[6].mxu1 }
 0x202   :  { %v217_v28 = vmax.f32 %v212_v25, 0.0  ;;  %v386_v29 = vpop.f32.mrb[7].mxu1 }
 0x204   :  { %v218_v30 = vpack.c.bf16 %v217_v28, %v217_v28 }
 0x206   :  { %404 = vmatmul.mubr.bf16.vlgmr.msra.gmra.mrb[0].mxu0 %v218_v30 }
 0x2d9   :  { %v324_v32 = vpop.f32.mrb[0].mxu0 }
 0x2da   :  { %v325_v33 = vadd.f32 %v347_v31, %v324_v32  ;;  %v405_v34 = vpop.f32.mrb[1].mxu0 }
 0x2db   :  { %v327_v35 = vpop.f32.mrb[2].mxu0 }
 0x2dc   :  { %427 = vtanh.f32 %v325_v33  ;;  %v406_v36 = vpop.f32.mrb[3].mxu0 }
 0x2e6   :  { %v428_v37 = vpop.eup %427 }
 0x2e7   :  { %331 = vst [vmem:[%s652_s7] sm:$0xff] %v428_v37 }
 0x2e8   :  { %336 = vsyncpa [#allocation3], 1 }
 0x2e9   :  { %337 = vsyncpa [#allocation5], 1 }
 0x2ea   :  { %338 = vsyncpa [#allocation8], 1 }

</bundles_post_ra>
